<compile_context>
chip_gen: v6e
topology: v6e:2x2x1
jax: 0.10.0
libtpu: 0.0.40
codegen_flags: <defaults>
</compile_context>

<pallas_src>
import functools

import jax
import jax.numpy as jnp
from jax.experimental import pallas as pl
from jax.experimental.pallas import tpu as pltpu


def _round_up(x: int, m: int) -> int:
    return ((x + m - 1) // m) * m


def _vmem_cap_bytes() -> int:
    """Per-generation scoped-VMEM cap (leave headroom below physical VMEM)."""
    phys = None
    try:
        phys = int(pltpu.get_tpu_info().vmem_capacity_bytes)
    except Exception:
        phys = None
    if not phys or phys <= 0:
        try:
            kind = jax.devices()[0].device_kind.lower()
        except Exception:
            kind = ""
        phys = 64 * 1024 * 1024 if ("v7" in kind or "7x" in kind) else 128 * 1024 * 1024
    # ~75% of physical (≈48 MiB on v7x, ≈96 MiB on v5e/v6e), never above 100 MiB.
    return int(min(100 * 1024 * 1024, (phys * 3) // 4))


def _default_num_splits() -> int:
    """Use both TensorCores on v7x (2 TC/chip); single stream elsewhere."""
    try:
        kind = jax.devices()[0].device_kind.lower()
    except Exception:
        return 1
    return 2 if ("v7" in kind or "7x" in kind) else 1


def _gram_partial_kernel(d_ref, out_ref, acc_ref):
    """Accumulate a partial Gram matrix G = sum_tiles d_tile^T @ d_tile per split."""
    i = pl.program_id(1)

    @pl.when(i == 0)
    def _init():
        acc_ref[...] = jnp.zeros_like(acc_ref)

    # Contract dim 0 of both operands: transposed-LHS matmul on the MXU, no
    # explicit XLU transpose of the [tn, C] tile; accumulate in f32.
    d = d_ref[...]
    acc_ref[...] += jax.lax.dot_general(
        d, d, (((0,), (0,)), ((), ())), preferred_element_type=jnp.float32
    )

    @pl.when(i == pl.num_programs(1) - 1)
    def _write():
        out_ref[0] = acc_ref[...]


def _mask_norm_kernel(g_ref, out_ref, *, dim: int, c: int, num_splits: int):
    """Sum per-split Grams, mask diagonal cluster blocks, Frobenius norm * 0.001."""
    g = g_ref[0]
    for s in range(1, num_splits):  # static unroll; num_splits is tiny (1 or 2)
        g = g + g_ref[s]
    row = jax.lax.broadcasted_iota(jnp.int32, (c, c), 0) // dim
    col = jax.lax.broadcasted_iota(jnp.int32, (c, c), 1) // dim
    # S in {0,1}: select g*g directly instead of (g*S)^2.
    sq = jnp.where(row == col, jnp.float32(0.0), g * g)
    out_ref[...] = (0.001 * jnp.sqrt(jnp.sum(sq))).reshape(1, 1)


def d_constraint2(d: jax.Array, dim: int, n_clusters: int, *,
                  tn: int | None = None, num_splits: int | None = None) -> jax.Array:
    """Scalar loss 0.001 * ||(d^T d) * S||_F where S masks the diagonal cluster blocks."""
    n, c = d.shape
    assert c == dim * n_clusters, "d.shape[1] must equal dim * n_clusters"

    itemsize = jnp.dtype(d.dtype).itemsize
    sublane = {4: 8, 2: 16, 1: 32}.get(itemsize, 8)   # dtype-aware sublane rounding
    c_lanes = _round_up(c, 128)                        # VMEM pads the lane dim to 128
    c_subl = _round_up(c, 8)

    cap = _vmem_cap_bytes()
    acc_bytes = c_subl * c_lanes * 4          # persistent f32 (C, C) accumulator
    out_block_bytes = c_subl * c_lanes * 4    # (1, C, C) partial-Gram output block
    min_tile_bytes = sublane * c_lanes * itemsize
    slack = 1 << 20

    # Large-C guard: the single persistent (C, C) accumulator must fit.
    assert acc_bytes + 2 * out_block_bytes + 2 * min_tile_bytes + slack <= cap, (
        "C too large for a single persistent (C, C) VMEM accumulator"
    )  # TODO(synk): add a (C_i, C_j, N)-tiled variant for very large C.

    if num_splits is None:
        num_splits = _default_num_splits()
    num_splits = max(1, min(num_splits, max(1, n // sublane)))

    # N-tile sized off the *padded* VMEM footprint: target ~4 MiB per buffer
    # (double-buffered), bounded by the per-generation VMEM cap.
    if tn is None:
        per_buf = min(4 << 20,
                      max(min_tile_bytes,
                          (cap - acc_bytes - 2 * out_block_bytes - slack) // 2))
        tn = max(sublane, (per_buf // (c_lanes * itemsize)) // sublane * sublane)

    rows_per_split = pl.cdiv(n, num_splits)
    tn_eff = max(sublane, _round_up(min(tn, rows_per_split), sublane))
    tiles_per_split = pl.cdiv(rows_per_split, tn_eff)
    n_pad = num_splits * tiles_per_split * tn_eff
    if n_pad != n:
        # Zero rows contribute nothing to d^T d.
        d = jnp.pad(d, ((0, n_pad - n), (0, 0)))

    need = acc_bytes + 2 * out_block_bytes + 2 * tn_eff * c_lanes * itemsize + slack
    vmem_limit = int(min(cap, max(16 * 1024 * 1024, 2 * need)))

    partial = pl.pallas_call(
        _gram_partial_kernel,
        out_shape=jax.ShapeDtypeStruct((num_splits, c, c), jnp.float32),
        grid_spec=pltpu.PrefetchScalarGridSpec(
            num_scalar_prefetch=0,
            grid=(num_splits, tiles_per_split),
            in_specs=[
                pl.BlockSpec((tn_eff, c),
                             lambda s, i, _t=tiles_per_split: (s * _t + i, 0)),
            ],
            out_specs=pl.BlockSpec((1, c, c), lambda s, i: (s, 0, 0)),
            scratch_shapes=[pltpu.VMEM((c, c), jnp.float32)],
        ),
        compiler_params=pltpu.CompilerParams(
            dimension_semantics=("parallel", "arbitrary"),
            vmem_limit_bytes=vmem_limit,
        ),
        cost_estimate=pl.CostEstimate(
            flops=2 * n_pad * c * c,
            transcendentals=0,
            bytes_accessed=n_pad * c * itemsize + num_splits * c * c * 4,
        ),
    )(d)

    finalize = functools.partial(
        _mask_norm_kernel, dim=dim, c=c, num_splits=num_splits)
    out = pl.pallas_call(
        finalize,
        out_shape=jax.ShapeDtypeStruct((1, 1), jnp.float32),
        grid_spec=pltpu.PrefetchScalarGridSpec(
            num_scalar_prefetch=0,
            grid=(1,),
            in_specs=[pl.BlockSpec((num_splits, c, c), lambda i: (0, 0, 0))],
            out_specs=pl.BlockSpec((1, 1), lambda i: (0, 0)),
        ),
        compiler_params=pltpu.CompilerParams(
            dimension_semantics=("arbitrary",),
        ),
        cost_estimate=pl.CostEstimate(
            flops=(num_splits + 2) * c * c,
            transcendentals=1,
            bytes_accessed=num_splits * c * c * 4 + 4,
        ),
    )(partial)
    return out[0, 0]


def _reference(d, dim, n_clusters):
    c = d.shape[1]
    S = jnp.ones((c, c), jnp.float32)
    for i in range(n_clusters):
        S = S.at[i * dim:(i + 1) * dim, i * dim:(i + 1) * dim].set(0.0)
    g = d.astype(jnp.float32).T @ d.astype(jnp.float32)
    return 0.001 * jnp.sqrt(jnp.sum((g * S) ** 2))


if __name__ == "__main__":
    key = jax.random.PRNGKey(0)
    # Shapes consistent with the module spec: dim=10, n_clusters=2 -> C=20.
    dim, n_clusters = 10, 2
    n = 24
    d = jax.random.normal(key, (n, dim * n_clusters), dtype=jnp.float32)

    ref = _reference(d, dim, n_clusters)

    # Multi-step reduction path (tn=8 -> several grid steps) with a forced
    # 2-way split (exercises the v7x dual-TensorCore layout on any generation).
    loss = jax.block_until_ready(d_constraint2(d, dim, n_clusters, tn=8, num_splits=2))
    assert jnp.allclose(loss, ref, rtol=1e-5, atol=1e-6), (loss, ref)

    # Default path: auto tile size (VMEM-budget derived) and auto split count.
    loss2 = jax.block_until_ready(d_constraint2(d, dim, n_clusters))
    assert jnp.allclose(loss2, ref, rtol=1e-5, atol=1e-6), (loss2, ref)

    print("KERNEL_OK")
</pallas_src>

<mosaic_0001>
module attributes {stable_mosaic.version = 11 : i64} {
  func.func @_gram_partial_kernel(%arg0: i32, %arg1: i32, %arg2: memref<8x20xf32, #tpu.memory_space<vmem>>, %arg3: memref<1x20x20xf32, #tpu.memory_space<vmem>>, %arg4: memref<20x20xf32, #tpu.memory_space<vmem>>) attributes {dimension_semantics = [#tpu.dimension_semantics<parallel>, #tpu.dimension_semantics<arbitrary>], iteration_bounds = array<i64: 2, 2>, scalar_prefetch = 0 : i64, scratch_operands = 1 : i64, tpu.core_type = #tpu.core_type<tc>, window_params = [{transform_indices = @transform_0, window_bounds = array<i64: 8, 20>}, {transform_indices = @transform_1, window_bounds = array<i64: 1, 20, 20>}]} {
    %c0_i32 = arith.constant 0 : i32
    %0 = arith.cmpi eq, %arg1, %c0_i32 : i32
    %1 = arith.extui %0 : i1 to i32
    %c0_i32_0 = arith.constant 0 : i32
    %2 = arith.cmpi ne, %1, %c0_i32_0 : i32
    scf.if %2 {
      %cst_7 = arith.constant 0.000000e+00 : f32
      %11 = vector.broadcast %cst_7 : f32 to vector<20x20xf32>
      %c0_8 = arith.constant 0 : index
      %c0_9 = arith.constant 0 : index
      %12 = vector.load %arg4[%c0_8, %c0_9] : memref<20x20xf32, #tpu.memory_space<vmem>>, vector<20x20xf32>
      tpu.vector_store %arg4[%c0_8, %c0_9], %11 {strides = array<i32>} : memref<20x20xf32, #tpu.memory_space<vmem>>, vector<20x20xf32>,
    } else {
    }
    %c0 = arith.constant 0 : index
    %c0_1 = arith.constant 0 : index
    %3 = vector.load %arg2[%c0, %c0_1] : memref<8x20xf32, #tpu.memory_space<vmem>>, vector<8x20xf32>
    %c0_2 = arith.constant 0 : index
    %c0_3 = arith.constant 0 : index
    %4 = vector.load %arg4[%c0_2, %c0_3] : memref<20x20xf32, #tpu.memory_space<vmem>>, vector<20x20xf32>
    %cst = arith.constant dense<0.000000e+00> : vector<20x20xf32>
    %5 = tpu.matmul %3, %3, %cst {dimension_numbers = #tpu.dot_dimension_numbers<[0], [0], [1], [1], [0, 1, 1, 1], [], []>} : vector<8x20xf32>, vector<8x20xf32>, vector<20x20xf32> -> vector<20x20xf32>
    %6 = arith.addf %4, %5 : vector<20x20xf32>
    %c0_4 = arith.constant 0 : index
    %c0_5 = arith.constant 0 : index
    %7 = vector.load %arg4[%c0_4, %c0_5] : memref<20x20xf32, #tpu.memory_space<vmem>>, vector<20x20xf32>
    tpu.vector_store %arg4[%c0_4, %c0_5], %6 {strides = array<i32>} : memref<20x20xf32, #tpu.memory_space<vmem>>, vector<20x20xf32>,
    %c1_i32 = arith.constant 1 : i32
    %8 = arith.cmpi eq, %arg1, %c1_i32 : i32
    %9 = arith.extui %8 : i1 to i32
    %c0_i32_6 = arith.constant 0 : i32
    %10 = arith.cmpi ne, %9, %c0_i32_6 : i32
    scf.if %10 {
      %c0_7 = arith.constant 0 : index
      %c0_8 = arith.constant 0 : index
      %11 = vector.load %arg4[%c0_7, %c0_8] : memref<20x20xf32, #tpu.memory_space<vmem>>, vector<20x20xf32>
      %c0_9 = arith.constant 0 : index
      %c0_10 = arith.constant 0 : index
      %c0_11 = arith.constant 0 : index
      %12 = vector.load %arg3[%c0_9, %c0_10, %c0_11] : memref<1x20x20xf32, #tpu.memory_space<vmem>>, vector<1x20x20xf32>
      %13 = vector.shape_cast %12 : vector<1x20x20xf32> to vector<20x20xf32>
      %14 = vector.shape_cast %11 : vector<20x20xf32> to vector<1x20x20xf32>
      tpu.vector_store %arg3[%c0_9, %c0_10, %c0_11], %14 {strides = array<i32>} : memref<1x20x20xf32, #tpu.memory_space<vmem>>, vector<1x20x20xf32>,
    } else {
    }
    return
  }
  func.func @transform_0(%arg0: i32, %arg1: i32) -> (i32, i32) {
    %c2_i32 = arith.constant 2 : i32
    %0 = arith.muli %arg0, %c2_i32 : i32
    %1 = arith.addi %0, %arg1 : i32
    %c0_i32 = arith.constant 0 : i32
    %c0_i32_0 = arith.constant 0 : i32
    return %1, %c0_i32 : i32, i32
  }
  func.func @transform_1(%arg0: i32, %arg1: i32) -> (i32, i32, i32) {
    %c0_i32 = arith.constant 0 : i32
    %c0_i32_0 = arith.constant 0 : i32
    %c0_i32_1 = arith.constant 0 : i32
    return %arg0, %c0_i32, %c0_i32_0 : i32, i32, i32
  }
}

</mosaic_0001>

<bundles_post_ra>
// kernel: tpu_custom_call.1
= control target key start
LH: loop header
LB: loop body
LE: loop exit
PB: predicated region body
PF: predicated region fallthrough
CT: control target
= control target key end

     0   :  { %s490_s6 = smov 0   ;;  %s492_s7 = smov 0   ;;  %s555_s0 = inlined_call_operand.vmem [shape: f32[32,20], index: 0, kind: input, shape index: {}]   ;;  %s556_s1 = inlined_call_operand.vmem [shape: f32[2,20,20], index: 1, kind: output, shape index: {}]  }
   0x1   :  { %s494_s8 = smov 0   ;;  %s496_s9 = smov 0  }
   0x2   :  { %s498_s10 = smov 0  }
   0x3 LB: > { %s20_s11 = sadd.s32 1, %s467_s8  ;;  %s23_s12 = sadd.s32 1, %s471_s9  ;;  %s475_s10 = sphi %s498_s10, %s11_s10   ;;  %s471_s9 = sphi %s496_s9, %s560_s9   ;;  %s467_s8 = sphi %s494_s8, %s559_s8   ;;  %s463_s7 = sphi %s492_s7, %s558_s7   ;;  %s459_s6 = sphi %s490_s6, %s557_s6  }
   0x4   : > { %p21_p0 = scmp.ge.s32.totalorder %s20_s11, 2  ;;  %p365_p1 = scmp.ge.s32.totalorder %s475_s10, 1 }
   0x5   : > { %p106_p2 = scmp.lt.s32.totalorder %s475_s10, 5 }
   0x6   : > { %s562_s11 = smov (%p21_p0, %s20_s11), 0  ;;  %s564_s12 = smov (!%p21_p0, %s23_s12), %s471_s9 }
   0x7   : > { %p107_p3 = pnand %p365_p1, %p106_p2  ;;  %p25_p4 = scmp.ge.s32.totalorder %s564_s12, 2 }
   0x8   : > { %s366_s13 = sshll.u32 (!%p107_p3), %s463_s7, 1  ;;  %p135_p5 = scmp.lt.s32.totalorder (!%p107_p3), %s463_s7, 1 }
   0x9   : > { %s566_s12 = smov (%p25_p4, %s564_s12), 0  ;;  %110 = sbr.rel (%p107_p3) target bundleno = 362 (0x16a), region = 24 }
   0xa   : > { %s128_s14 = sadd.s32 (!%p107_p3), %s459_s6, %s366_s13  ;;  %p369_p7 = scmp.ne.s32.totalorder (!%p107_p3), %s459_s6, 0 }
   0xb   : > { %p129_p6 = scmp.lt.s32.totalorder (!%p107_p3), %s128_s14, 3 }
   0xe   : > { %s568_s7 = smov (!%p135_p5, %s463_s7), 1  ;;  %s570_s14 = smov (!%p129_p6, %s128_s14), 3 }
   0xf   : > { %s393_s15 = smul.u32 24, %s568_s7  ;;  %s367_s16 = sshll.u32 %s570_s14, 3 }
  0x10   : > { %s132_s19 = scalar_lea.vmem %s555_s0, %s367_s16  ;;  %143 = sbr.rel (%p369_p7) target bundleno = 24 (0x18), region = 28 }
  0x11   : > { %s529_s22 = scalar_lea.vmem %s556_s1, %s393_s15 }
  0x15   : > { %vm144_vm0 = vcmask 162816   ;;  %vm147_vm1 = vcmask 158720   ;;  %v477_v0 = vmov 0.0  }
  0x16   : > { %145 = vst.msk [vmem:[#allocation2] sm:$0xff] %vm144_vm0, %v477_v0  ;;  %146 = vst.msk [vmem:[#allocation2 + $0x8] sm:$0xff] %vm144_vm0, %v477_v0 }
  0x17   : > { %148 = vst.msk [vmem:[#allocation2 + $0x10] sm:$0xf] %vm147_vm1, %v477_v0 }
  0x18 PF: > { %v149_v1 = vld [vmem:[%s132_s19] sm:$0xff]  ;;  %v478_v2 = vmov 0.0   ;;  %vm479_vm2 = vmmov 0   ;;  %vm185_vm3 = vcmask 64512   ;;  %vm278_vm4 = vcmask 162816   ;;  %p373_p8 = scmp.ne.s32.totalorder %s459_s6, 1 }
  0x19   : > { %153 = vxpose.xlu0.b32.start.end [1/1] (short) (narrow) %v149_v1, 24  ;;  %380 = vmatprep.subr.mxu0 %v478_v2  ;;  %vm281_vm5 = vcmask 158720  }
  0x1a   : > { %382 = vmatprep.mubr.msk.f32.mxu0 %vm479_vm2, %v478_v2  ;;  %381 = vmatpush3.msra.mxu0 %v149_v1 }
  0x1b   : > { %391 = vmatprep.subr.mxu1 %v478_v2  ;;  %385 = vmatprep.mubr.msk.f32.mxu1 %vm479_vm2, %v478_v2 }
  0x1c   : > { %392 = vmatpush3.msra.mxu1 %v149_v1 }
  0x1d   : > { %v150_v6 = vld [vmem:[#allocation2] sm:$0xff]  ;;  %v151_v10 = vld [vmem:[#allocation2 + $0x8] sm:$0xff] }
  0x1e   : > { %v152_v14 = vld [vmem:[#allocation2 + $0x10] sm:$0xf] }
  0x95   : > { %v169_v3 = vpop.trf.xlu0 }
  0x96   : > { %383 = vmatmul.mubr.msk.f32.vlgmr.msra.gmra.mxu0 %vm185_vm3, %v169_v3 }
  0x99   : > { %v170_v4 = vpop.trf.xlu0 }
  0x9a   : > { %386 = vmatmul.mubr.msk.f32.vlgmr.msra.gmra.mxu1 %vm185_vm3, %v170_v4 }
  0x9b   : > { %388 = vmatprep.mubr.msk.f32.mxu1 %vm479_vm2, %v478_v2 }
  0x9d   : > { %v171_v5 = vpop.trf.xlu0 }
  0x9e   : > { %389 = vmatmul.mubr.msk.f32.gmra.mxu1 %vm185_vm3, %v171_v5 }
 0x156   : > { %v261_v7 = vpop.f32.mrf.mxu0 }
 0x157   : > { %v275_v8 = vadd.f32 %v261_v7, %v150_v6 }
 0x158   : > { %v384_v9 = vpop.f32.mrf.mxu0 }
 0x159   : > { %279 = vst.msk [vmem:[#allocation2] sm:$0xff] %vm278_vm4, %v275_v8 }
 0x15a   : > { %v266_v11 = vpop.f32.mrf.mxu1 }
 0x15b   : > { %v276_v12 = vadd.f32 %v266_v11, %v151_v10 }
 0x15c   : > { %v387_v13 = vpop.f32.mrf.mxu1 }
 0x15d   : > { %280 = vst.msk [vmem:[#allocation2 + $0x8] sm:$0xff] %vm278_vm4, %v276_v12  ;;  %286 = sbr.rel (%p373_p8) target bundleno = 362 (0x16a), region = 32 }
 0x15e   : > { %v271_v15 = vpop.f32.mrf.mxu1 }
 0x15f   : > { %v277_v16 = vadd.f32 %v271_v15, %v152_v14 }
 0x160   : > { %v390_v17 = vpop.f32.mrf.mxu1 }
 0x161   : > { %282 = vst.msk [vmem:[#allocation2 + $0x10] sm:$0xf] %vm281_vm5, %v277_v16 }
 0x162   : > { %v287_v18 = vld [vmem:[#allocation2] sm:$0xff] }
 0x163   : > { %290 = vst.msk [vmem:[%s529_s22] sm:$0xff] %vm278_vm4, %v287_v18 }
 0x164   : > { %v288_v19 = vld [vmem:[#allocation2 + $0x8] sm:$0xff] }
 0x165   : > { %291 = vst.msk [vmem:[%s529_s22 + $0x8] sm:$0xff] %vm278_vm4, %v288_v19 }
 0x168   : > { %v289_v20 = vld [vmem:[#allocation2 + $0x10] sm:$0xf] }
 0x169   : > { %292 = vst.msk [vmem:[%s529_s22 + $0x10] sm:$0xf] %vm281_vm5, %v289_v20 }
 0x16a PF: > { %s11_s10 = sadd.s32 1, %s475_s10   ;;  %s557_s6 = smov %s467_s8 }
 0x16b   : > { %p8_p9 = scmp.ge.s32.totalorder %s11_s10, 6   ;;  %s558_s7 = smov %s471_s9 }
 0x16c   : > { %s559_s8 = smov %s562_s11  ;;  %s560_s9 = smov %s566_s12 }
 0x16d   :  { %10 = sbr.rel (!%p8_p9) target bundleno = 3 (0x3), region = 62 }

</bundles_post_ra>
